<compile_context>
chip_gen: v7x
topology: tpu7x:2x2x1
jax: 0.10.0
libtpu: 0.0.40
codegen_flags: <defaults>
</compile_context>

<pallas_src>
import numpy as np
import jax
import jax.numpy as jnp
from jax.experimental import pallas as pl
from jax.experimental.pallas import tpu as pltpu

IM_H, IM_W = 16, 16          # im_h, im_w globals from the PyTorch script
KSIZE = 21                   # self.kernel_size
PAD = KSIZE // 2
SIGMA = 2.0
NI = 0.01                    # self.ni
EPOCHS = 10000               # epochs used to build self.t schedule


# ------------- deterministic operator construction (numpy, import time) -----

def _gaussian_1d_np(ksize, sigma):
    x = np.arange(ksize, dtype=np.float64) - ksize // 2
    k = np.exp(-(x ** 2) / (2.0 * sigma ** 2))
    return k / k.sum()


def _conv_eff_matrix_np(n, k1d, pad):
    # Interior slice of the banded cross-correlation matrix:
    # C[i, j] = k1d[j - i + pad] (zero outside kernel support), so that
    # C @ image performs torch.conv2d's 1D cross-correlation with zero pad.
    K = k1d.shape[0]
    i = np.arange(n)[:, None]
    j = np.arange(n)[None, :]
    idx = j - i + pad
    valid = (idx >= 0) & (idx < K)
    return np.where(valid, k1d[np.clip(idx, 0, K - 1)], 0.0)


def _interp_matrix_np(n):
    # Row/col mixing matrix replicating F.grid_sample(bilinear,
    # align_corners=False, padding_mode='border') for torch.linspace(-1, 1, n).
    coords = np.linspace(-1.0, 1.0, n)
    pix = ((coords + 1.0) * n - 1.0) / 2.0
    i0 = np.floor(pix)
    frac = pix - i0
    i0c = np.clip(i0, 0, n - 1).astype(np.int64)
    i1c = np.clip(i0 + 1, 0, n - 1).astype(np.int64)
    M = np.zeros((n, n))
    np.add.at(M, (np.arange(n), i0c), 1.0 - frac)
    np.add.at(M, (np.arange(n), i1c), frac)
    return M


def _central_diff_matrix_np(n):
    # D[i, i+1] = 0.5, D[i, i-1] = -0.5 for interior rows; boundary rows zero
    # (matches the constant-zero padding in `grad`).
    D = np.zeros((n, n))
    for i in range(1, n - 1):
        D[i, i + 1] = 0.5
        D[i, i - 1] = -0.5
    return D


def _build_operator_stack():
    assert IM_H == IM_W, "operators stacked into one buffer assume square maps"
    k1d = _gaussian_1d_np(KSIZE, SIGMA)
    ch = _conv_eff_matrix_np(IM_H, k1d, PAD)           # (H, H)  left blur op
    cw = _conv_eff_matrix_np(IM_W, k1d, PAD).T         # (W, W)  right blur op
    ry = _interp_matrix_np(IM_H)                       # (H, H)
    rxt = _interp_matrix_np(IM_W).T                    # (W, W)
    dh = _central_diff_matrix_np(IM_H)                 # (H, H)
    dwt = _central_diff_matrix_np(IM_W).T              # (W, W)
    dhry = dh @ ry                                     # folded: Dh @ Ry
    rxtdwt = rxt @ dwt                                 # folded: Rx^T @ Dw^T
    return np.stack([ch, cw, ry, rxt, dhry, rxtdwt]).astype(np.float32)


_OPS_STACK = _build_operator_stack()                   # (6, H, W) constants


# ---------------------------------- kernel ----------------------------------

def eocc_loss_kernel(ops_ref, x_ref, t_ref, out_ref):
    # ops_ref: (6, H, W) stacked constant operators (one DMA)
    # x_ref:   (2, H, W) stacked [e_occ_map, arctan(phi/0.1)] (one DMA)
    # t_ref:   (1,) SMEM scalar schedule value t[epoch]
    e_map = x_ref[0]
    atan_phi = x_ref[1]

    # H(phi) = 0.5 * (1 + 2 * arctan(phi / 0.1) / pi)   (arctan passed in)
    h_phi = 0.5 * (1.0 + 2.0 * atan_phi / jnp.pi)

    ch = ops_ref[0]
    cw = ops_ref[1]
    ry = ops_ref[2]
    rxt = ops_ref[3]
    dhry = ops_ref[4]
    rxtdwt = ops_ref[5]

    # Gaussian blur of e_occ: separable 21x21 cross-correlation with zero pad,
    # expressed as two 16x16 matmuls (padding folded into ch/cw).
    blur = jnp.dot(
        jnp.dot(ch, e_map, preferred_element_type=jnp.float32),
        cw, preferred_element_type=jnp.float32)

    # Gradients of the grid_sampled H(phi): central differences with zero
    # boundary, with the difference operators pre-folded into the
    # interpolation matrices -> two independent depth-2 MXU chains.
    gx = jnp.dot(
        jnp.dot(dhry, h_phi, preferred_element_type=jnp.float32),
        rxt, preferred_element_type=jnp.float32)
    gy = jnp.dot(
        jnp.dot(ry, h_phi, preferred_element_type=jnp.float32),
        rxtdwt, preferred_element_type=jnp.float32)
    grad_l1 = jnp.abs(gx) + jnp.abs(gy)                # ||.||_1 over dim 0

    t = t_ref[0]
    out_map = blur * h_phi + t * (1.0 - h_phi) + NI * grad_l1
    out_ref[0, 0] = jnp.sum(out_map) * (1.0 / (IM_H * IM_W))


# --------------------------------- wrapper ----------------------------------

def _eocc_loss_impl(e_occ, phi, epoch):
    e_map = e_occ.reshape(IM_H, IM_W).astype(jnp.float32)
    phi_map = phi.reshape(IM_H, IM_W).astype(jnp.float32)

    # TODO(synk): arctan has no Mosaic TPU lowering; compute it in plain JAX
    # and finish H(phi) inside the kernel.
    atan_phi = jnp.arctan(phi_map / 0.1)
    x = jnp.stack([e_map, atan_phi])                   # (2, H, W) single input

    # Closed form of self.t[epoch] = 100 * exp(-linspace(0,1)[epoch] * ln(100))
    t = 100.0 * np.exp(-(epoch / (EPOCHS - 1)) * np.log(100.0))
    t_e = jnp.full((1,), np.float32(t), dtype=jnp.float32)

    ops = jnp.asarray(_OPS_STACK)

    vmem = pl.BlockSpec(memory_space=pltpu.MemorySpace.VMEM)
    smem = pl.BlockSpec(memory_space=pltpu.MemorySpace.SMEM)

    out = pl.pallas_call(
        eocc_loss_kernel,
        out_shape=jax.ShapeDtypeStruct((1, 1), jnp.float32),
        in_specs=[vmem, vmem, smem],
        out_specs=smem,
        # Tiny, overhead-bound kernel: advise the scheduler it is cheap.
        cost_estimate=pl.CostEstimate(
            flops=6 * 2 * IM_H * IM_H * IM_W + 8 * IM_H * IM_W,
            transcendentals=0,
            bytes_accessed=(6 + 2) * IM_H * IM_W * 4 + 8),
    )(ops, x, t_e)
    return out[0, 0]


# epoch static so the wrapper glue (reshape/arctan/stack) fuses under one jit.
eocc_loss = jax.jit(_eocc_loss_impl, static_argnums=2)


# ---------------------------- numpy reference --------------------------------

def eocc_loss_ref(e_occ, phi, epoch):
    e_map = np.asarray(e_occ, dtype=np.float64).reshape(IM_H, IM_W)
    phi_map = np.asarray(phi, dtype=np.float64).reshape(IM_H, IM_W)
    k1d = _gaussian_1d_np(KSIZE, SIGMA)
    G = np.outer(k1d, k1d)
    e_pad = np.pad(e_map, PAD)
    blur = np.zeros((IM_H, IM_W))
    for a in range(KSIZE):
        for b in range(KSIZE):
            blur += G[a, b] * e_pad[a:a + IM_H, b:b + IM_W]
    h_phi = 0.5 * (1.0 + 2.0 * np.arctan(phi_map / 0.1) / np.pi)
    ry = _interp_matrix_np(IM_H)
    rx = _interp_matrix_np(IM_W)
    iv = ry @ h_phi @ rx.T
    gx = np.zeros((IM_H, IM_W))
    gx[1:-1, :] = (iv[2:, :] - iv[:-2, :]) / 2.0
    gy = np.zeros((IM_H, IM_W))
    gy[:, 1:-1] = (iv[:, 2:] - iv[:, :-2]) / 2.0
    grad_l1 = np.abs(gx) + np.abs(gy)
    weights = np.linspace(0.0, 1.0, EPOCHS)
    t = (100.0 * np.exp(-weights * np.log(100.0)))[epoch]
    out_map = blur * h_phi + t * (1.0 - h_phi) + NI * grad_l1
    return out_map.mean()


if __name__ == "__main__":
    key = jax.random.PRNGKey(0)
    k1, k2 = jax.random.split(key)
    e_occ = jax.random.uniform(k1, (IM_H * IM_W,), dtype=jnp.float32)
    phi = jax.random.normal(k2, (IM_H * IM_W,), dtype=jnp.float32)
    epoch = 42

    loss = eocc_loss(e_occ, phi, epoch)
    loss = jax.block_until_ready(loss)

    ref = eocc_loss_ref(e_occ, phi, epoch)
    assert np.allclose(np.asarray(loss), ref, rtol=1e-4, atol=1e-4), (
        float(loss), float(ref))
    print("KERNEL_OK")
</pallas_src>

<mosaic_0001>
module attributes {stable_mosaic.version = 11 : i64} {
  func.func @eocc_loss_kernel(%arg0: memref<6x16x16xf32, #tpu.memory_space<vmem>>, %arg1: memref<2x16x16xf32, #tpu.memory_space<vmem>>, %arg2: memref<1xf32, #tpu.memory_space<smem>>, %arg3: memref<1x1xf32, #tpu.memory_space<smem>>) attributes {dimension_semantics = [], scalar_prefetch = 0 : i64, scratch_operands = 0 : i64, tpu.core_type = #tpu.core_type<tc>} {
    %c0 = arith.constant 0 : index
    %c0_0 = arith.constant 0 : index
    %c0_1 = arith.constant 0 : index
    %0 = vector.load %arg1[%c0, %c0_0, %c0_1] : memref<2x16x16xf32, #tpu.memory_space<vmem>>, vector<1x16x16xf32>
    %1 = vector.shape_cast %0 : vector<1x16x16xf32> to vector<16x16xf32>
    %c1 = arith.constant 1 : index
    %c0_2 = arith.constant 0 : index
    %c0_3 = arith.constant 0 : index
    %2 = vector.load %arg1[%c1, %c0_2, %c0_3] : memref<2x16x16xf32, #tpu.memory_space<vmem>>, vector<1x16x16xf32>
    %3 = vector.shape_cast %2 : vector<1x16x16xf32> to vector<16x16xf32>
    %cst = arith.constant 2.000000e+00 : f32
    %4 = vector.broadcast %cst : f32 to vector<16x16xf32>
    %5 = arith.mulf %4, %3 : vector<16x16xf32>
    %cst_4 = arith.constant 3.14159274 : f32
    %6 = vector.broadcast %cst_4 : f32 to vector<16x16xf32>
    %7 = arith.divf %5, %6 : vector<16x16xf32>
    %cst_5 = arith.constant 1.000000e+00 : f32
    %8 = vector.broadcast %cst_5 : f32 to vector<16x16xf32>
    %9 = arith.addf %8, %7 : vector<16x16xf32>
    %cst_6 = arith.constant 5.000000e-01 : f32
    %10 = vector.broadcast %cst_6 : f32 to vector<16x16xf32>
    %11 = arith.mulf %10, %9 : vector<16x16xf32>
    %c0_7 = arith.constant 0 : index
    %c0_8 = arith.constant 0 : index
    %c0_9 = arith.constant 0 : index
    %12 = vector.load %arg0[%c0_7, %c0_8, %c0_9] : memref<6x16x16xf32, #tpu.memory_space<vmem>>, vector<1x16x16xf32>
    %13 = vector.shape_cast %12 : vector<1x16x16xf32> to vector<16x16xf32>
    %c1_10 = arith.constant 1 : index
    %c0_11 = arith.constant 0 : index
    %c0_12 = arith.constant 0 : index
    %14 = vector.load %arg0[%c1_10, %c0_11, %c0_12] : memref<6x16x16xf32, #tpu.memory_space<vmem>>, vector<1x16x16xf32>
    %15 = vector.shape_cast %14 : vector<1x16x16xf32> to vector<16x16xf32>
    %c2 = arith.constant 2 : index
    %c0_13 = arith.constant 0 : index
    %c0_14 = arith.constant 0 : index
    %16 = vector.load %arg0[%c2, %c0_13, %c0_14] : memref<6x16x16xf32, #tpu.memory_space<vmem>>, vector<1x16x16xf32>
    %17 = vector.shape_cast %16 : vector<1x16x16xf32> to vector<16x16xf32>
    %c3 = arith.constant 3 : index
    %c0_15 = arith.constant 0 : index
    %c0_16 = arith.constant 0 : index
    %18 = vector.load %arg0[%c3, %c0_15, %c0_16] : memref<6x16x16xf32, #tpu.memory_space<vmem>>, vector<1x16x16xf32>
    %19 = vector.shape_cast %18 : vector<1x16x16xf32> to vector<16x16xf32>
    %c4 = arith.constant 4 : index
    %c0_17 = arith.constant 0 : index
    %c0_18 = arith.constant 0 : index
    %20 = vector.load %arg0[%c4, %c0_17, %c0_18] : memref<6x16x16xf32, #tpu.memory_space<vmem>>, vector<1x16x16xf32>
    %21 = vector.shape_cast %20 : vector<1x16x16xf32> to vector<16x16xf32>
    %c5 = arith.constant 5 : index
    %c0_19 = arith.constant 0 : index
    %c0_20 = arith.constant 0 : index
    %22 = vector.load %arg0[%c5, %c0_19, %c0_20] : memref<6x16x16xf32, #tpu.memory_space<vmem>>, vector<1x16x16xf32>
    %23 = vector.shape_cast %22 : vector<1x16x16xf32> to vector<16x16xf32>
    %cst_21 = arith.constant dense<0.000000e+00> : vector<16x16xf32>
    %24 = tpu.matmul %13, %1, %cst_21 {dimension_numbers = #tpu.dot_dimension_numbers<[1], [0], [0], [1], [0, 0, 1, 1], [], []>} : vector<16x16xf32>, vector<16x16xf32>, vector<16x16xf32> -> vector<16x16xf32>
    %cst_22 = arith.constant dense<0.000000e+00> : vector<16x16xf32>
    %25 = tpu.matmul %24, %15, %cst_22 {dimension_numbers = #tpu.dot_dimension_numbers<[1], [0], [0], [1], [0, 0, 1, 1], [], []>} : vector<16x16xf32>, vector<16x16xf32>, vector<16x16xf32> -> vector<16x16xf32>
    %cst_23 = arith.constant dense<0.000000e+00> : vector<16x16xf32>
    %26 = tpu.matmul %21, %11, %cst_23 {dimension_numbers = #tpu.dot_dimension_numbers<[1], [0], [0], [1], [0, 0, 1, 1], [], []>} : vector<16x16xf32>, vector<16x16xf32>, vector<16x16xf32> -> vector<16x16xf32>
    %cst_24 = arith.constant dense<0.000000e+00> : vector<16x16xf32>
    %27 = tpu.matmul %26, %19, %cst_24 {dimension_numbers = #tpu.dot_dimension_numbers<[1], [0], [0], [1], [0, 0, 1, 1], [], []>} : vector<16x16xf32>, vector<16x16xf32>, vector<16x16xf32> -> vector<16x16xf32>
    %cst_25 = arith.constant dense<0.000000e+00> : vector<16x16xf32>
    %28 = tpu.matmul %17, %11, %cst_25 {dimension_numbers = #tpu.dot_dimension_numbers<[1], [0], [0], [1], [0, 0, 1, 1], [], []>} : vector<16x16xf32>, vector<16x16xf32>, vector<16x16xf32> -> vector<16x16xf32>
    %cst_26 = arith.constant dense<0.000000e+00> : vector<16x16xf32>
    %29 = tpu.matmul %28, %23, %cst_26 {dimension_numbers = #tpu.dot_dimension_numbers<[1], [0], [0], [1], [0, 0, 1, 1], [], []>} : vector<16x16xf32>, vector<16x16xf32>, vector<16x16xf32> -> vector<16x16xf32>
    %30 = math.absf %27 : vector<16x16xf32>
    %31 = math.absf %29 : vector<16x16xf32>
    %32 = arith.addf %30, %31 : vector<16x16xf32>
    %c0_27 = arith.constant 0 : index
    %33 = memref.load %arg2[%c0_27] : memref<1xf32, #tpu.memory_space<smem>>
    %34 = arith.mulf %25, %11 : vector<16x16xf32>
    %cst_28 = arith.constant 1.000000e+00 : f32
    %35 = vector.broadcast %cst_28 : f32 to vector<16x16xf32>
    %36 = arith.subf %35, %11 : vector<16x16xf32>
    %37 = vector.broadcast %33 : f32 to vector<16x16xf32>
    %38 = arith.mulf %37, %36 : vector<16x16xf32>
    %39 = arith.addf %34, %38 : vector<16x16xf32>
    %cst_29 = arith.constant 0.00999999977 : f32
    %40 = vector.broadcast %cst_29 : f32 to vector<16x16xf32>
    %41 = arith.mulf %40, %32 : vector<16x16xf32>
    %42 = arith.addf %39, %41 : vector<16x16xf32>
    %43 = vector.shape_cast %42 : vector<16x16xf32> to vector<1x16x16xf32>
    %cst_30 = arith.constant dense<0.000000e+00> : vector<1xf32>
    %44 = vector.multi_reduction <add>, %43, %cst_30 [1, 2] : vector<1x16x16xf32> to vector<1xf32>
    %45 = vector.shape_cast %44 : vector<1xf32> to vector<1x1x1xf32>
    %46 = vector.extract %45[0, 0, 0] : f32 from vector<1x1x1xf32>
    %cst_31 = arith.constant 3.906250e-03 : f32
    %47 = arith.mulf %46, %cst_31 : f32
    %c0_32 = arith.constant 0 : index
    %c0_33 = arith.constant 0 : index
    %48 = memref.load %arg3[%c0_32, %c0_33] : memref<1x1xf32, #tpu.memory_space<smem>>
    memref.store %47, %arg3[%c0_32, %c0_33] : memref<1x1xf32, #tpu.memory_space<smem>>
    return
  }
}

</mosaic_0001>

<bundles_post_ra>
// kernel: _eocc_loss_impl.1
= control target key start
LH: loop header
LB: loop body
LE: loop exit
PB: predicated region body
PF: predicated region fallthrough
CT: control target
= control target key end

     0   :  { %vm47_vm0 = vcmask 130048   ;;  %s809_s0 = inlined_call_operand.vmem [shape: f32[6,16,16], index: 0, kind: input, shape index: {}]   ;;  %s810_s1 = inlined_call_operand.vmem [shape: f32[2,16,16], index: 1, kind: input, shape index: {}]   ;;  %s811_s2 = inlined_call_operand.<no memory space> [shape: f32[1], index: 2, kind: input, shape index: {}]   ;;  %s812_s3 = inlined_call_operand.hbm [shape: f32[1,1], index: 3, kind: output, shape index: {}]  }
   0x1   :  { %v16_v0 = vld [vmem:[%s810_s1] sm:$0xff]  ;;  %v17_v1 = vld [vmem:[%s810_s1 + $0x8] sm:$0xff]  ;;  %v582_v4 = vld [vmem:[%s810_s1 + $0x10] sm:$0xff] }
   0x2   :  { %v30_v2 = vld [vmem:[%s809_s0] sm:$0xff]  ;;  %v672_v3 = vpack.c.bf16 %v17_v1, %v16_v0  ;;  %v583_v5 = vld [vmem:[%s810_s1 + $0x18] sm:$0xff]  ;;  %v21_v6 = vmul.f32 2.0, %v582_v4  ;;  %v31_v8 = vld [vmem:[%s809_s0 + $0x8] sm:$0xff] }
   0x3   :  { %634 = vmatprep.mubr.msk.f32.mxu0 %vm47_vm0, %v30_v2  ;;  %v22_v7 = vmul.f32 2.0, %v583_v5  ;;  %v584_v9 = vld [vmem:[%s809_s0 + $0x10] sm:$0xff]  ;;  %v585_v10 = vld [vmem:[%s809_s0 + $0x18] sm:$0xff] }
   0x4   :  { %673 = vmatprep.subr.bf16.mxu0 %v672_v3  ;;  %v24_v11 = vmul.f32 0.31830987, %v21_v6  ;;  %v676_v13 = vpack.c.bf16 %v585_v10, %v584_v9 }
   0x5   :  { %675 = vmatpush3.bf16.msra.mxu0 %v672_v3  ;;  %v25_v12 = vmul.f32 0.31830987, %v22_v7 }
   0x6   :  { %9 = vsyncpa [#allocation4], 0  ;;  %v590_v14 = vld [vmem:[%s809_s0 + $0x40] sm:$0xff]  ;;  %v26_v15 = vadd.f32 1.0, %v24_v11  ;;  %677 = vmatprep.subr.bf16.mxu1 %v676_v13  ;;  %v591_v20 = vld [vmem:[%s809_s0 + $0x48] sm:$0xff]  ;;  %v545_v40 = vstv %s811_s2  ;;  %s699_s20 = scalar_lea.hbm %s812_s3, 16 }
   0x7   :  { %v27_v16 = vadd.f32 1.0, %v25_v12  ;;  %679 = vmatpush3.bf16.msra.mxu1 %v676_v13  ;;  %v586_v21 = vld [vmem:[%s809_s0 + $0x20] sm:$0xff]  ;;  %v587_v22 = vld [vmem:[%s809_s0 + $0x28] sm:$0xff]  ;;  %v588_v23 = vld [vmem:[%s809_s0 + $0x30] sm:$0xff]  ;;  %p700_p0 = scmp.ne.s32.totalorder %s812_s3, %s699_s20  ;;  %p703_p1 = scmp.lt.u32.totalorder %s699_s20, %s812_s3 }
   0x8   :  { %635 = vmatmul.mubr.msk.f32.vlgmr.msra.gmra.mrb[0].mxu0 %vm47_vm0, %v31_v8  ;;  %v28_v17 = vmul.f32 0.5, %v26_v15  ;;  %v589_v24 = vld [vmem:[%s809_s0 + $0x38] sm:$0xff]  ;;  %v592_v26 = vld [vmem:[%s809_s0 + $0x50] sm:$0xff] }
   0x9   :  { %v29_v18 = vmul.f32 0.5, %v27_v16  ;;  %648 = vmatprep.mubr.msk.f32.mxu0 %vm47_vm0, %v590_v14  ;;  %v684_v25 = vpack.c.bf16 %v589_v24, %v588_v23  ;;  %v593_v27 = vld [vmem:[%s809_s0 + $0x58] sm:$0xff]  ;;  %p705_p2 = pnand %p703_p1, %p700_p0 }
   0xa   :  { %v692_v30 = vpack.c.bf16 %v593_v27, %v592_v26  ;;  %v543_v41 = vsub.f32 1.0, %v28_v17 }
   0xb   :  { %v680_v19 = vpack.c.bf16 %v29_v18, %v28_v17  ;;  %685 = vmatprep.subr.bf16.mxu1 %v684_v25  ;;  %v544_v38 = vsub.f32 1.0, %v29_v18 }
   0xc   :  { %v546_v49 = vmul.f32 %v545_v40, %v543_v41 }
   0xd   :  { %681 = vmatprep.subr.bf16.mxu0 %v680_v19  ;;  %v547_v44 = vmul.f32 %v545_v40, %v544_v38 }
   0xe   :  { %683 = vmatpush3.bf16.msra.mxu0 %v680_v19 }
   0xf   :  { %689 = vmatprep.subr.bf16.mxu0 %v680_v19 }
  0x11   :  { %649 = vmatmul.mubr.msk.f32.vlgmr.msra.gmra.mrb[2].mxu0 %vm47_vm0, %v591_v20 }
  0x12   :  { %691 = vmatpush3.bf16.msra.mxu0 %v680_v19  ;;  %662 = vmatprep.mubr.msk.f32.mxu0 %vm47_vm0, %v586_v21 }
  0x15   :  { %663 = vmatmul.mubr.msk.f32.vlgmr.msra.gmra.mrb[4].mxu0 %vm47_vm0, %v587_v22 }
  0xdb   :  { %v636_v28 = vpop.f32.mrb[0].mxu0 }
  0xdc   :  { %v120_v29 = vpop.f32.mrb[1].mxu0 }
  0xdd   :  { %641 = vmatprep.mubr.msk.f32.mxu1 %vm47_vm0, %v120_v29 }
  0xde   :  { %642 = vmatmul.mubr.msk.f32.vlgmr.msra.gmra.mrb[0].mxu1 %vm47_vm0, %v636_v28 }
  0xdf   :  { %687 = vmatpush3.bf16.msra.mxu1 %v684_v25 }
  0xe0   :  { %693 = vmatprep.subr.bf16.mxu1 %v692_v30 }
  0xe4   :  { %v650_v31 = vpop.f32.mrb[2].mxu0 }
  0xe5   :  { %v282_v32 = vpop.f32.mrb[3].mxu0 }
  0xe6   :  { %655 = vmatprep.mubr.msk.f32.mxu1 %vm47_vm0, %v282_v32 }
  0xe7   :  { %656 = vmatmul.mubr.msk.f32.vlgmr.msra.gmra.mrb[2].mxu1 %vm47_vm0, %v650_v31 }
  0xe8   :  { %v664_v33 = vpop.f32.mrb[4].mxu0  ;;  %695 = vmatpush3.bf16.msra.mxu1 %v692_v30 }
  0xe9   :  { %v444_v34 = vpop.f32.mrb[5].mxu0 }
  0xea   :  { %669 = vmatprep.mubr.msk.f32.mxu1 %vm47_vm0, %v444_v34 }
  0xeb   :  { %670 = vmatmul.mubr.msk.f32.vlgmr.msra.gmra.mrb[4].mxu1 %vm47_vm0, %v664_v33 }
 0x1b1   :  { %v643_v35 = vpop.f32.mrb[0].mxu1 }
 0x1b2   :  { %v201_v36 = vpop.f32.mrb[1].mxu1  ;;  %v542_v43 = vmul.f32 %v643_v35, %v29_v18 }
 0x1b3   :  { %v541_v48 = vmul.f32 %v201_v36, %v28_v17 }
 0x1b4   :  { %v549_v54 = vadd.f32 %v547_v44, %v542_v43 }
 0x1b5   :  { %v548_v56 = vadd.f32 %v546_v49, %v541_v48 }
 0x1ba   :  { %v657_v37 = vpop.f32.mrb[2].mxu1 }
 0x1bb   :  { %v363_v39 = vpop.f32.mrb[3].mxu1  ;;  %v535_v45 = vand.u32 2147483647, %v657_v37 }
 0x1bc   :  { %v534_v50 = vand.u32 2147483647, %v363_v39 }
 0x1be   :  { %v671_v42 = vpop.f32.mrb[4].mxu1 }
 0x1bf   :  { %v537_v46 = vand.u32 2147483647, %v671_v42  ;;  %v525_v47 = vpop.f32.mrb[5].mxu1 }
 0x1c0   :  { %v536_v51 = vand.u32 2147483647, %v525_v47 }
 0x1c1   :  { %v539_v52 = vadd.f32 %v537_v46, %v535_v45 }
 0x1c2   :  { %v538_v53 = vadd.f32 %v536_v51, %v534_v50 }
 0x1c3   :  { %v551_v55 = vmul.f32 0.01, %v539_v52 }
 0x1c4   :  { %v550_v57 = vmul.f32 0.01, %v538_v53 }
 0x1c5   :  { %v553_v58 = vadd.f32 %v551_v55, %v549_v54 }
 0x1c6   :  { %v552_v59 = vadd.f32 %v550_v57, %v548_v56 }
 0x1c7   :  { %v555_v60 = vsel %vm47_vm0, %v553_v58, 0.0 }
 0x1c8   :  { %v554_v61 = vsel %vm47_vm0, %v552_v59, 0.0 }
 0x1c9   :  { %v556_v62 = vadd.f32 %v555_v60, %v554_v61 }
 0x1cb   :  { %557 = vadd.xlane.f32.xlu0 %v556_v62 }
 0x258   :  { %v558_v63 = vpop.xlane.xlu0 %557 }
 0x259   :  { %v559_v0 = vrot.slane %v558_v63, 4 }
 0x25b   :  { %v560_v1 = vadd.f32 %v559_v0, %v558_v63 }
 0x25d   :  { %v561_v2 = vrot.slane %v560_v1, 2 }
 0x25f   :  { %v562_v3 = vadd.f32 %v561_v2, %v560_v1 }
 0x261   :  { %v563_v4 = vrot.slane %v562_v3, 1 }
 0x263   :  { %v564_v5 = vadd.f32 %v563_v4, %v562_v3 }
 0x265   :  { %696 = vpush %v564_v5 }
 0x296   :  { %s697_s2 = spop %696 }
 0x297   :  { %s566_s17 = smul.f32 0.00390625, %s697_s2 }
 0x299   :  { %568 = sst [smem:[#allocation3]] %s566_s17 }
 0x29a   :  { %708 = shalt.err (!%p705_p2)
}
 0x29b   :  { %s711_s25 = smov [#allocation3]  }
 0x29c   :  { %576 = dma.smem_to_hbm %s711_s25, 16, %s812_s3, [#allocation4]  }
 0x29d   :  { %709 = dma.done.wait [#allocation4], 16  }
 0x29e   :  { %710 = vsyncadd [#allocation4], 4294967280 }
 0x29f   :  { %580 = sfence }
 0x2a0   :  { %581 = vsyncpa [#allocation4], 1 }

</bundles_post_ra>
